<compile_context>
chip_gen: v6e
topology: v6e:2x2x1
jax: 0.10.0
libtpu: 0.0.40
codegen_flags: <defaults>
</compile_context>

<pallas_src>
import functools

import jax
import jax.numpy as jnp
from jax.experimental import pallas as pl
from jax.experimental.pallas import tpu as pltpu


def _attention_kernel(enc_ref, dec_ref, ctx_ref, w_ref,
                      m_sc, l_sc, acc_sc, *tile_sc,
                      seq_len, block_s, seq_blocks):
    """Grid = (batch_tiles, seq_tiles); the sequence axis is the inner reduction axis."""
    k = pl.program_id(1)

    enc = enc_ref[...]            # (TB, TS, H), native dtype (no f32 copy)
    dec = dec_ref[...]            # (TB, H)

    # Scores for this sequence tile, laid out (TB, TS): batch on sublanes,
    # sequence on lanes, so exp/max/sum and all stores are lane-dense.  Same
    # contraction pattern as the reference flash kernel (f32 MXU accumulation,
    # no explicit encoder transpose).
    s = jnp.einsum("bqh,bkh->bqk", dec[:, None, :], enc,
                   preferred_element_type=jnp.float32)[:, 0, :]   # (TB, TS) f32

    if seq_blocks == 1:
        # Single-tile path (block_s == seq_len): plain softmax, direct writes,
        # no online-softmax state and no probability scratch.
        m = jnp.max(s, axis=-1, keepdims=True)
        p = jnp.exp(s - m)                                        # (TB, S) f32
        inv_l = pl.reciprocal(jnp.sum(p, axis=-1, keepdims=True), approx=False)
        ctx = jnp.einsum("bqk,bkd->bqd", p[:, None, :].astype(enc.dtype), enc,
                         preferred_element_type=jnp.float32)[:, 0, :]   # (TB, H)
        ctx_ref[...] = (ctx * inv_l).astype(ctx_ref.dtype)
        w_ref[...] = (p * inv_l).astype(w_ref.dtype)
        return

    # ----------------- multi-tile (online-softmax) path -----------------
    p_sc, mt_sc = tile_sc

    @pl.when(k == 0)
    def _init():
        m_sc[...] = jnp.full_like(m_sc, -jnp.inf)
        l_sc[...] = jnp.zeros_like(l_sc)
        acc_sc[...] = jnp.zeros_like(acc_sc)

    # Mask sequence positions past the true length (handles S % block_s != 0);
    # masked columns contribute exp(-inf) == 0 to the softmax.
    col = jax.lax.broadcasted_iota(jnp.int32, s.shape, 1) + k * block_s
    s = jnp.where(col < seq_len, s, -jnp.inf)

    m_prev = m_sc[...]                                            # (TB, 1)
    m_new = jnp.maximum(m_prev, jnp.max(s, axis=-1, keepdims=True))
    alpha = jnp.exp(m_prev - m_new)                               # (TB, 1)
    p = jnp.exp(s - m_new)                                        # (TB, TS) f32

    l_sc[...] = alpha * l_sc[...] + jnp.sum(p, axis=-1, keepdims=True)
    ctx_part = jnp.einsum("bqk,bkd->bqd", p[:, None, :].astype(enc.dtype), enc,
                          preferred_element_type=jnp.float32)[:, 0, :]   # (TB, H)
    acc_sc[...] = alpha * acc_sc[...] + ctx_part
    m_sc[...] = m_new

    # Stash this tile's probabilities lane-dense (leading-axis dynamic index only:
    # no transposes, no lane-axis dynamic offsets) plus the tile-local running max
    # so the finalize rescale needs only a tiny (TB, 1) exp per tile.
    p_sc[k] = p
    mt_sc[k] = m_new

    @pl.when(k == seq_blocks - 1)
    def _finalize():
        # Exact reciprocal: attn_weights are a user-visible output.
        inv_l = pl.reciprocal(l_sc[...], approx=False)            # (TB, 1)
        m_fin = m_sc[...]                                         # (TB, 1)
        ctx_ref[...] = (acc_sc[...] * inv_l).astype(ctx_ref.dtype)
        # Pure-VPU, lane-dense rescale per tile: w_j = p_j * exp(m_j - m_fin) / l.
        for j in range(seq_blocks):
            lo = j * block_s
            width = min(block_s, seq_len - lo)
            scale = jnp.exp(mt_sc[j] - m_fin) * inv_l             # (TB, 1)
            w_tile = (p_sc[j] * scale).astype(w_ref.dtype)        # (TB, TS)
            w_ref[:, lo:lo + width] = w_tile[:, :width]


def _resident_vmem_bytes(bb, bs, S, H, in_item, out_item):
    """Approximate per-step resident VMEM footprint for a (bb, bs) tiling."""
    nblk = -(-S // bs)
    r = 2 * bb * bs * H * in_item          # encoder tile (double-buffered)
    r += 2 * bb * H * in_item              # decoder block
    r += 2 * bb * H * out_item             # context output block
    r += 2 * bb * S * out_item             # attn-weight output block (resident)
    r += bb * H * 4                        # f32 context accumulator
    r += 4 * bb * 128 * 4                  # m / l scratch (lane-padded) slack
    if nblk > 1:
        r += nblk * bb * bs * 4            # per-tile probability scratch
        r += nblk * bb * 128 * 4           # per-tile running-max scratch (padded)
    return r


def _vmem_config():
    """(scoped vmem limit cap, resident-tile budget) per TPU generation."""
    cap = None
    try:
        cap = getattr(pltpu.get_tpu_info(), "vmem_capacity_bytes", None)
    except Exception:
        cap = None
    if cap is None:
        cap = 64 * 1024 * 1024                           # conservative fallback
    if cap >= 128 * 1024 * 1024:                         # v5e / v6e (128 MiB)
        return 96 * 1024 * 1024, 64 * 1024 * 1024
    return 48 * 1024 * 1024, 32 * 1024 * 1024            # v7x (64 MiB physical)


def _choose_blocks(B, S, H, in_item, out_item, budget_bytes):
    """Pick (block_b, block_s): prefer the full-sequence single-tile path, then the
    largest multiple-of-128 sequence tile; shrink block_b before block_s."""
    sub = max(8, 32 // in_item)            # sublane multiple for the seq dim

    def fits(bb, bs):
        return _resident_vmem_bytes(bb, bs, S, H, in_item, out_item) <= budget_bytes

    def best_bs(bb):
        if fits(bb, S):
            return S                       # single-tile path: no online softmax
        bs = (S // 128) * 128
        while bs >= 128:
            if fits(bb, bs):
                return bs
            bs -= 128
        bs = (min(S, 128) // sub) * sub
        while bs >= sub:
            if fits(bb, bs):
                return bs
            bs -= sub
        return None

    if B <= 8:
        cand_bbs = [B]
    else:
        bb0 = min(32, (B // 8) * 8)        # cap at 32: keep s/p in the vreg file
        if B >= 16:
            # keep >= 2 steps on the "parallel" batch axis (2-TC chips, v7x)
            bb0 = min(bb0, max(8, ((B // 2) // 8) * 8))
        cand_bbs = list(range(bb0, 7, -8))

    candidates = []
    for bb in cand_bbs:
        bs = best_bs(bb)
        if bs is not None:
            candidates.append((bb, bs))
    if not candidates:
        return int(cand_bbs[-1]), int(max(sub, min(S, 128)))      # best effort
    for bb, bs in candidates:              # largest bb that still gets the full seq
        if bs == S:
            return int(bb), int(bs)
    bb, bs = max(candidates, key=lambda c: (c[1], c[0]))          # then largest seq tile
    return int(bb), int(bs)


def attention(encoder_outputs, decoder_hidden, *, block_b=None, block_s=None,
              vmem_budget_bytes=None):
    """encoder_outputs: (B, S, H); decoder_hidden: (B, H).
    Returns (context_vector (B, H), attn_weights (B, S))."""
    B, S, H = encoder_outputs.shape
    assert decoder_hidden.shape == (B, H)
    assert decoder_hidden.dtype == encoder_outputs.dtype

    in_item = jnp.dtype(encoder_outputs.dtype).itemsize
    out_item = in_item
    limit_cap, auto_budget = _vmem_config()
    budget = auto_budget if vmem_budget_bytes is None else vmem_budget_bytes

    auto_bb, auto_bs = _choose_blocks(B, S, H, in_item, out_item, budget)
    block_b = auto_bb if block_b is None else min(int(block_b), B)
    block_s = auto_bs if block_s is None else min(int(block_s), S)

    grid_b = -(-B // block_b)
    grid_s = -(-S // block_s)

    resident = _resident_vmem_bytes(block_b, block_s, S, H, in_item, out_item)
    vmem_limit = int(min(limit_cap, max(32 * 1024 * 1024, resident + 8 * 1024 * 1024)))

    kernel = functools.partial(_attention_kernel, seq_len=S,
                               block_s=block_s, seq_blocks=int(grid_s))

    out_shapes = (
        jax.ShapeDtypeStruct((B, H), encoder_outputs.dtype),   # context_vector
        jax.ShapeDtypeStruct((B, S), encoder_outputs.dtype),   # attn_weights
    )

    scratch_shapes = [
        pltpu.VMEM((block_b, 1), jnp.float32),                  # running max m
        pltpu.VMEM((block_b, 1), jnp.float32),                  # running sum l
        pltpu.VMEM((block_b, H), jnp.float32),                  # f32 context accumulator
    ]
    if grid_s > 1:
        scratch_shapes += [
            pltpu.VMEM((grid_s, block_b, block_s), jnp.float32),  # per-tile probs
            pltpu.VMEM((grid_s, block_b, 1), jnp.float32),        # per-tile max
        ]

    grid_spec = pltpu.PrefetchScalarGridSpec(
        num_scalar_prefetch=0,
        grid=(int(grid_b), int(grid_s)),
        in_specs=[
            # Large contiguous encoder tiles: batch + sequence tiled, H whole.
            pl.BlockSpec((block_b, block_s, H), lambda b, k: (b, k, 0)),
            # Decoder row block: resident across the sequence axis.
            pl.BlockSpec((block_b, H), lambda b, k: (b, 0)),
        ],
        out_specs=[
            # Outputs stay resident (accumulator pattern) across the sequence axis
            # and are written lane-dense.
            pl.BlockSpec((block_b, H), lambda b, k: (b, 0)),
            pl.BlockSpec((block_b, S), lambda b, k: (b, 0)),
        ],
        scratch_shapes=scratch_shapes,
    )

    return pl.pallas_call(
        kernel,
        out_shape=out_shapes,
        grid_spec=grid_spec,
        compiler_params=pltpu.CompilerParams(
            # Batch axis parallel (megacore / 2-TC), sequence axis sequential.
            dimension_semantics=("parallel", "arbitrary"),
            vmem_limit_bytes=vmem_limit,
        ),
    )(encoder_outputs, decoder_hidden)


def _attention_ref(encoder_outputs, decoder_hidden):
    # Pure-JAX reference matching the PyTorch forward.
    scores = jnp.einsum("bsh,bh->bs", encoder_outputs, decoder_hidden)
    attn_weights = jax.nn.softmax(scores, axis=1)
    context = jnp.einsum("bs,bsh->bh", attn_weights, encoder_outputs)
    return context, attn_weights


if __name__ == "__main__":
    key = jax.random.PRNGKey(0)
    k1, k2, k3, k4 = jax.random.split(key, 4)

    # Small shapes matching the module's bmm convention.
    B, S, H = 2, 8, 32
    encoder_outputs = jax.random.normal(k1, (B, S, H), dtype=jnp.float32)
    decoder_hidden = jax.random.normal(k2, (B, H), dtype=jnp.float32)

    ctx, w = attention(encoder_outputs, decoder_hidden)
    jax.block_until_ready((ctx, w))

    ctx_exp, w_exp = _attention_ref(encoder_outputs, decoder_hidden)
    assert ctx.shape == (B, H) and w.shape == (B, S)
    assert jnp.allclose(ctx, ctx_exp, atol=2e-5, rtol=2e-5)
    assert jnp.allclose(w, w_exp, atol=2e-5, rtol=2e-5)

    # Exercise the batched + sequence-tiled (online-softmax) path: grid (2, 2).
    B2, S2, H2 = 16, 256, 128
    enc2 = jax.random.normal(k3, (B2, S2, H2), dtype=jnp.float32)
    dec2 = jax.random.normal(k4, (B2, H2), dtype=jnp.float32)
    ctx2, w2 = attention(enc2, dec2, block_b=8, block_s=128)
    jax.block_until_ready((ctx2, w2))
    ctx2_exp, w2_exp = _attention_ref(enc2, dec2)
    assert jnp.allclose(ctx2, ctx2_exp, atol=2e-5, rtol=2e-5)
    assert jnp.allclose(w2, w2_exp, atol=2e-5, rtol=2e-5)

    # Auto-tiling path on the same shapes: should pick the full-sequence tile
    # with >= 2 parallel batch steps.
    ctx3, w3 = attention(enc2, dec2)
    jax.block_until_ready((ctx3, w3))
    assert jnp.allclose(ctx3, ctx2_exp, atol=2e-5, rtol=2e-5)
    assert jnp.allclose(w3, w2_exp, atol=2e-5, rtol=2e-5)

    print("KERNEL_OK")
</pallas_src>

<mosaic_0001>
module attributes {stable_mosaic.version = 11 : i64} {
  func.func @_attention_kernel(%arg0: i32, %arg1: i32, %arg2: memref<2x8x32xf32, #tpu.memory_space<vmem>>, %arg3: memref<2x32xf32, #tpu.memory_space<vmem>>, %arg4: memref<2x32xf32, #tpu.memory_space<vmem>>, %arg5: memref<2x8xf32, #tpu.memory_space<vmem>>, %arg6: memref<2x1xf32, #tpu.memory_space<vmem>>, %arg7: memref<2x1xf32, #tpu.memory_space<vmem>>, %arg8: memref<2x32xf32, #tpu.memory_space<vmem>>) attributes {dimension_semantics = [#tpu.dimension_semantics<parallel>, #tpu.dimension_semantics<arbitrary>], iteration_bounds = array<i64: 1, 1>, scalar_prefetch = 0 : i64, scratch_operands = 3 : i64, tpu.core_type = #tpu.core_type<tc>, window_params = [{transform_indices = @transform_0, window_bounds = array<i64: 2, 8, 32>}, {transform_indices = @transform_1, window_bounds = array<i64: 2, 32>}, {transform_indices = @transform_2, window_bounds = array<i64: 2, 32>}, {transform_indices = @transform_3, window_bounds = array<i64: 2, 8>}]} {
    %c0 = arith.constant 0 : index
    %c0_0 = arith.constant 0 : index
    %c0_1 = arith.constant 0 : index
    %0 = vector.load %arg2[%c0, %c0_0, %c0_1] : memref<2x8x32xf32, #tpu.memory_space<vmem>>, vector<2x8x32xf32>
    %c0_2 = arith.constant 0 : index
    %c0_3 = arith.constant 0 : index
    %1 = vector.load %arg3[%c0_2, %c0_3] : memref<2x32xf32, #tpu.memory_space<vmem>>, vector<2x32xf32>
    %2 = vector.shape_cast %1 : vector<2x32xf32> to vector<2x1x32xf32>
    "tpu.trace_start"() <{level = 10 : i32, message = "bqh,bkh->bqk"}> : () -> ()
    %cst = arith.constant dense<0.000000e+00> : vector<2x1x8xf32>
    %3 = tpu.matmul %2, %0, %cst {dimension_numbers = #tpu.dot_dimension_numbers<[2], [2], [1], [1], [0, 0, 0, 1, 1, 1], [0], [0]>} : vector<2x1x32xf32>, vector<2x8x32xf32>, vector<2x1x8xf32> -> vector<2x1x8xf32>
    "tpu.trace_stop"() : () -> ()
    %4 = vector.shape_cast %3 : vector<2x1x8xf32> to vector<2x8xf32>
    %cst_4 = arith.constant dense<0xFF800000> : vector<2xf32>
    %5 = vector.multi_reduction <maximumf>, %4, %cst_4 [1] : vector<2x8xf32> to vector<2xf32>
    %6 = vector.shape_cast %5 : vector<2xf32> to vector<2x1xf32>
    %7 = vector.broadcast %6 : vector<2x1xf32> to vector<2x8xf32>
    %8 = arith.subf %4, %7 : vector<2x8xf32>
    %9 = math.exp %8 : vector<2x8xf32>
    %cst_5 = arith.constant dense<0.000000e+00> : vector<2xf32>
    %10 = vector.multi_reduction <add>, %9, %cst_5 [1] : vector<2x8xf32> to vector<2xf32>
    %11 = vector.shape_cast %10 : vector<2xf32> to vector<2x1xf32>
    %12 = tpu.reciprocal %11 : vector<2x1xf32> -> vector<2x1xf32>
    %13 = vector.shape_cast %9 : vector<2x8xf32> to vector<2x1x8xf32>
    "tpu.trace_start"() <{level = 10 : i32, message = "bqk,bkd->bqd"}> : () -> ()
    %cst_6 = arith.constant dense<0.000000e+00> : vector<2x1x32xf32>
    %14 = tpu.matmul %13, %0, %cst_6 {dimension_numbers = #tpu.dot_dimension_numbers<[2], [1], [1], [2], [0, 0, 0, 1, 1, 2], [0], [0]>} : vector<2x1x8xf32>, vector<2x8x32xf32>, vector<2x1x32xf32> -> vector<2x1x32xf32>
    "tpu.trace_stop"() : () -> ()
    %15 = vector.shape_cast %14 : vector<2x1x32xf32> to vector<2x32xf32>
    %16 = vector.broadcast %12 : vector<2x1xf32> to vector<2x32xf32>
    %17 = arith.mulf %15, %16 : vector<2x32xf32>
    %c0_7 = arith.constant 0 : index
    %c0_8 = arith.constant 0 : index
    %18 = vector.load %arg4[%c0_7, %c0_8] : memref<2x32xf32, #tpu.memory_space<vmem>>, vector<2x32xf32>
    tpu.vector_store %arg4[%c0_7, %c0_8], %17 {strides = array<i32>} : memref<2x32xf32, #tpu.memory_space<vmem>>, vector<2x32xf32>,
    %19 = vector.broadcast %12 : vector<2x1xf32> to vector<2x8xf32>
    %20 = arith.mulf %9, %19 : vector<2x8xf32>
    %c0_9 = arith.constant 0 : index
    %c0_10 = arith.constant 0 : index
    %21 = vector.load %arg5[%c0_9, %c0_10] : memref<2x8xf32, #tpu.memory_space<vmem>>, vector<2x8xf32>
    tpu.vector_store %arg5[%c0_9, %c0_10], %20 {strides = array<i32>} : memref<2x8xf32, #tpu.memory_space<vmem>>, vector<2x8xf32>,
    return
  }
  func.func @transform_0(%arg0: i32, %arg1: i32) -> (i32, i32, i32) {
    %c0_i32 = arith.constant 0 : i32
    %c0_i32_0 = arith.constant 0 : i32
    return %arg0, %arg1, %c0_i32 : i32, i32, i32
  }
  func.func @transform_1(%arg0: i32, %arg1: i32) -> (i32, i32) {
    %c0_i32 = arith.constant 0 : i32
    %c0_i32_0 = arith.constant 0 : i32
    return %arg0, %c0_i32 : i32, i32
  }
  func.func @transform_2(%arg0: i32, %arg1: i32) -> (i32, i32) {
    %c0_i32 = arith.constant 0 : i32
    %c0_i32_0 = arith.constant 0 : i32
    return %arg0, %c0_i32 : i32, i32
  }
  func.func @transform_3(%arg0: i32, %arg1: i32) -> (i32, i32) {
    %c0_i32 = arith.constant 0 : i32
    %c0_i32_0 = arith.constant 0 : i32
    return %arg0, %c0_i32 : i32, i32
  }
}

</mosaic_0001>

<bundles_post_ra>
// kernel: tpu_custom_call.1
= control target key start
LH: loop header
LB: loop body
LE: loop exit
PB: predicated region body
PF: predicated region fallthrough
CT: control target
= control target key end

     0   :  { %9 = vsyncpa [#allocation6], 0  ;;  %s633_s0 = inlined_call_operand.hbm [shape: f32[2,8,32], index: 0, kind: input, shape index: {}]   ;;  %s634_s1 = inlined_call_operand.hbm [shape: f32[2,32], index: 1, kind: input, shape index: {}]   ;;  %s635_s2 = inlined_call_operand.hbm [shape: f32[2,32], index: 2, kind: output, shape index: {0}]   ;;  %s636_s3 = inlined_call_operand.hbm [shape: f32[2,8], index: 3, kind: output, shape index: {1}]  }
   0x1   :  { %10 = vsyncpa [#allocation9], 0 }
   0x2   :  { %11 = vsyncpa [#allocation7], 0 }
   0x3   :  { %12 = vsyncpa [#allocation12], 0  ;;  %s581_s12 = smov [#allocation5]  }
   0x4   :  { %s18_s13 = sshll.u32 %s581_s12, 4  ;;  %s19_s13 = int_to_ptr.vmem [resolvable:$true] %s18_s13 }
   0x5   :  { %s501_s14 = scalar_lea.vmem %s19_s13, 256  ;;  %p506_p1 = scmp.lt.s32.totalorder %s19_s13, %s19_s13 }
   0x6   :  { %p502_p0 = scmp.ne.s32.totalorder %s19_s13, %s501_s14  ;;  %p507_p2 = scmp.lt.s32.totalorder %s501_s14, %s501_s14 }
   0x8   :  { %p508_p3 = por %p507_p2, %p506_p1 }
   0xa   :  { %p509_p4 = pnand %p508_p3, %p502_p0 }
   0xc   :  { %512 = shalt.err (!%p509_p4)
}
   0xd   :  { %s582_s15 = smov 128   ;;  %s583_s16 = smov 8  }
   0xe   :  { %24 = dma.hbm_to_vmem [thread:$0]  %s633_s0, 256, %s19_s13, [#allocation6], %s582_s15, %s582_s15, %s583_s16  }
   0xf   :  { %s584_s19 = smov [#allocation8]  }
  0x10   :  { %s31_s20 = sshll.u32 %s584_s19, 4  ;;  %s32_s20 = int_to_ptr.vmem [resolvable:$true] %s31_s20 }
  0x11   :  { %s521_s21 = scalar_lea.vmem %s32_s20, 32  ;;  %p526_p6 = scmp.lt.s32.totalorder %s32_s20, %s32_s20 }
  0x12   :  { %p522_p5 = scmp.ne.s32.totalorder %s32_s20, %s521_s21  ;;  %p527_p7 = scmp.lt.s32.totalorder %s521_s21, %s521_s21 }
  0x14   :  { %p528_p8 = por %p527_p7, %p526_p6 }
  0x16   :  { %p529_p9 = pnand %p528_p8, %p522_p5 }
  0x18   :  { %532 = shalt.err (!%p529_p9)
}
  0x19   :  { %34 = dma.hbm_to_vmem [thread:$0]  %s634_s1, 32, %s32_s20, [#allocation9]  }
  0x1a   :  { %573 = dma.done.wait [#allocation6], 256  }
  0x1b   :  { %574 = vsyncadd [#allocation6], 4294967040 }
  0x1c   :  { %575 = dma.done.wait [#allocation9], 32  }
  0x1d   :  { %576 = vsyncadd [#allocation9], 4294967264  ;;  %v56_v0 = vlaneseq  ;;  %v585_v1 = vmov 0.0   ;;  %vm586_vm0 = vmmov 0   ;;  %v587_v2 = vmov 1966171168  }
  0x1e   :  { %458 = vmatprep.subr.mxu0 %v585_v1  ;;  %463 = vmatprep.subr.mxu1 %v585_v1  ;;  %v54_v3 = vunpack.c.l.s4 %v587_v2  ;;  %vm67_vm1 = vcmask 261120   ;;  %v41_v7 = vld [vmem:[#allocation5] sm:$0xff]  ;;  %v42_v8 = vld [vmem:[#allocation5 + $0x8] sm:$0xff]  ;;  %vm221_vm2 = vcmask 1041409   ;;  %vm224_vm3 = vcmask 58368   ;;  %s588_s0 = smov [#allocation11]  }
  0x1f   :  { %460 = vmatprep.mubr.msk.f32.mxu0 %vm586_vm0, %v585_v1  ;;  %465 = vmatprep.mubr.msk.f32.mxu1 %vm586_vm0, %v585_v1  ;;  %v57_v4 = vshrl.u32 %v56_v0, 7  ;;  %v443_v9 = vld.sshfl [vmem:[#allocation8] sm:$0x11 pattern:$0x75316420]  ;;  %vm247_vm4 = vcmask 64512  }
  0x20   :  { %v55_v5 = vunpack.c.0.s8 %v54_v3  ;;  %459 = vmatpush3.xpose.msk.msra.mxu0 %vm67_vm1, %v41_v7  ;;  %464 = vmatpush3.xpose.msk.msra.mxu1 %vm67_vm1, %v42_v8  ;;  %v52_v11 = vcombine.high %v443_v9, %v443_v9  ;;  %s429_s1 = sshll.u32 %s588_s0, 4  ;;  %s430_s1 = int_to_ptr.vmem [resolvable:$true] %s429_s1 }
  0x21   :  { %473 = vmatprep.subr.mxu1 %v585_v1  ;;  %468 = vmatprep.subr.mxu0 %v585_v1  ;;  %s533_s24 = scalar_lea.vmem %s430_s1, 32  ;;  %p538_p11 = scmp.lt.s32.totalorder %s430_s1, %s430_s1 }
  0x22   :  { %v58_v6 = vsub.s32 %v55_v5, %v57_v4  ;;  %p534_p10 = scmp.ne.s32.totalorder %s430_s1, %s533_s24  ;;  %p539_p12 = scmp.lt.s32.totalorder %s533_s24, %s533_s24 }
  0x24   :  { %v59_v10 = vrot.slane %v443_v9, %v58_v6  ;;  %v66_v12 = vrot.slane %v52_v11, %v58_v6  ;;  %p540_p13 = por %p539_p12, %p538_p11 }
  0x26   :  { %461 = vmatmul.mubr.msk.f32.vlgmr.msra.gmra.mxu0 %vm67_vm1, %v59_v10  ;;  %466 = vmatmul.mubr.msk.f32.vlgmr.msra.gmra.mxu1 %vm67_vm1, %v66_v12  ;;  %p541_p0 = pnand %p540_p13, %p534_p10 }
  0x27   :  { %469 = vmatpush3.msra.mxu0 %v41_v7  ;;  %474 = vmatpush3.msra.mxu1 %v42_v8 }
  0x28   :  { %470 = vmatprep.mubr.msk.f32.mxu0 %vm586_vm0, %v585_v1  ;;  %475 = vmatprep.mubr.msk.f32.mxu1 %vm586_vm0, %v585_v1 }
  0xe6   :  { %v139_v13 = vpop.f32.mrf.mxu0  ;;  %v214_v14 = vpop.f32.mrf.mxu1 }
  0xe7   :  { %v220_v15 = vrot.slane %v214_v14, 7 }
  0xe8   :  { %v462_v16 = vpop.f32.mrf.mxu0  ;;  %v467_v17 = vpop.f32.mrf.mxu1 }
  0xe9   :  { %v222_v18 = vsel %vm221_vm2, %v220_v15, %v139_v13 }
  0xea   :  { %v225_v19 = vsel %vm224_vm3, %v222_v18, -inf }
  0xeb   :  { %226 = vmax.xlane.f32.xlu0 %v225_v19 }
 0x174   :  { %v227_v20 = vpop.xlane.xlu0 %226 }
 0x175   :  { %v229_v21 = vrot.slane %v227_v20, 1  ;;  %v232_v22 = vsub.f32 %v139_v13, %v227_v20 }
 0x177   :  { %v233_v23 = vsub.f32 %v214_v14, %v229_v21  ;;  %v234_v24 = vmul.f32 1.442695, %v232_v22 }
 0x179   :  { %487 = vpow2.f32 %v234_v24  ;;  %v236_v25 = vmul.f32 1.442695, %v233_v23 }
 0x17b   :  { %489 = vpow2.f32 %v236_v25 }
 0x186   :  { %v488_v26 = vpop.eup %487 }
 0x187   :  { %471 = vmatmul.mubr.msk.f32.vlgmr.msra.gmra.mxu0 %vm247_vm4, %v488_v26 }
 0x188   :  { %v490_v27 = vpop.eup %489 }
 0x189   :  { %476 = vmatmul.mubr.msk.f32.vlgmr.msra.gmra.mxu1 %vm247_vm4, %v490_v27  ;;  %v240_v28 = vrot.slane %v490_v27, 7 }
 0x18b   :  { %v241_v29 = vsel %vm221_vm2, %v240_v28, %v488_v26 }
 0x18c   :  { %v243_v30 = vsel %vm224_vm3, %v241_v29, 0.0 }
 0x18d   :  { %244 = vadd.xlane.f32.xlu0 %v243_v30 }
 0x216   :  { %v245_v31 = vpop.xlane.xlu0 %244 }
 0x217   :  { %491 = vrcp.f32 %v245_v31 }
 0x224   :  { %v492_v32 = vpop.eup %491 }
 0x225   :  { %v393_v33 = vrot.slane %v492_v32, 1  ;;  %v405_v36 = vmul.f32 %v492_v32, %v488_v26 }
 0x227   :  { %v406_v34 = vmul.f32 %v490_v27, %v393_v33 }
 0x229   :  { %v409_v35 = vrot.slane %v406_v34, 7 }
 0x22b   :  { %v410_v37 = vsel %vm221_vm2, %v409_v35, %v405_v36 }
 0x22c   :  { %412 = vst.msk [vmem:[#allocation11] sm:$0x3] %vm224_vm3, %v410_v37 }
 0x22d   :  { %544 = shalt.err (!%p541_p0)
}
 0x22e   :  { %432 = dma.vmem_to_hbm [thread:$0]  %s430_s1, 32, %s636_s3, [#allocation12]   ;;  %vm403_vm5 = vcmask 254976  }
 0x22f   :  { %s589_s27 = smov [#allocation10]  }
 0x230   :  { %s419_s28 = sshll.u32 %s589_s27, 4  ;;  %s420_s28 = int_to_ptr.vmem [resolvable:$true] %s419_s28 }
 0x231   :  { %s553_s29 = scalar_lea.vmem %s420_s28, 32  ;;  %p558_p2 = scmp.lt.s32.totalorder %s420_s28, %s420_s28 }
 0x232   :  { %p554_p1 = scmp.ne.s32.totalorder %s420_s28, %s553_s29  ;;  %p559_p3 = scmp.lt.s32.totalorder %s553_s29, %s553_s29 }
 0x234   :  { %p560_p4 = por %p559_p3, %p558_p2 }
 0x236   :  { %p561_p5 = pnand %p560_p4, %p554_p1 }
 0x247   :  { %v316_v38 = vpop.f32.mrf.mxu0 }
 0x248   :  { %v396_v43 = vmul.f32 %v492_v32, %v316_v38 }
 0x249   :  { %v472_v39 = vpop.f32.mrf.mxu0  ;;  %v388_v40 = vpop.f32.mrf.mxu1 }
 0x24a   :  { %v397_v41 = vmul.f32 %v393_v33, %v388_v40 }
 0x24b   :  { %v477_v42 = vpop.f32.mrf.mxu1 }
 0x24c   :  { %v400_v44 = vrot.slane %v397_v41, 7 }
 0x24e   :  { %v401_v45 = vsel %vm221_vm2, %v400_v44, %v396_v43 }
 0x24f   :  { %404 = vst.msk [vmem:[#allocation10] sm:$0x3] %vm403_vm5, %v401_v45 }
 0x250   :  { %564 = shalt.err (!%p561_p5)
}
 0x251   :  { %422 = dma.vmem_to_hbm [thread:$0]  %s420_s28, 32, %s635_s2, [#allocation7]  }
 0x252   :  { %577 = dma.done.wait [#allocation7], 32  }
 0x253   :  { %578 = vsyncadd [#allocation7], 4294967264 }
 0x254   :  { %579 = dma.done.wait [#allocation12], 32  }
 0x255   :  { %580 = vsyncadd [#allocation12], 4294967264 }
 0x256   :  { %439 = vsyncpa [#allocation6], 1 }
 0x257   :  { %440 = vsyncpa [#allocation9], 1 }
 0x258   :  { %441 = vsyncpa [#allocation7], 1 }
 0x259   :  { %442 = vsyncpa [#allocation12], 1 }

</bundles_post_ra>
